<compile_context>
chip_gen: v7x
topology: tpu7x:2x2x1
jax: 0.10.0
libtpu: 0.0.40
codegen_flags: <defaults>
</compile_context>

<pallas_src>
import functools

import jax
import jax.numpy as jnp
from jax.experimental import pallas as pl
from jax.experimental.pallas import tpu as pltpu

LANE = 128     # f32 lane width
SUBLANE = 8    # f32 sublane height


def _round_up(n, m):
    return ((n + m - 1) // m) * m


def _mlp_kernel(x_ref, wx_ref, bx_ref, w1h_ref, w2h_ref, out_ref, *,
                h0p, h1p, out_dim, compute_dtype):
    # Cast x on the VPU inside the kernel (free slot; kernel is MXU/DMA bound)
    # instead of a separate XLA cast pass over HBM.
    x = x_ref[...].astype(compute_dtype)

    # One fused x-side projection for all three layers: [W0 | W1_x | W2_x].
    # K = in_dim is very shallow for the MXU, so a single wide-N push replaces
    # three separate systolic fills. Fused bias [b0 | b1 | b2] added once in f32.
    xz = jnp.dot(x, wx_ref[...], preferred_element_type=jnp.float32)
    xz = xz + bx_ref[...]

    # Layer 0: relu(x @ W0 + b0)            (lane-aligned slice [:, :h0p])
    h0 = jnp.maximum(xz[:, :h0p], 0.0)

    # Layer 1: relu(h0 @ W1_h + x @ W1_x + b1)
    h1 = jnp.maximum(
        xz[:, h0p:h0p + h1p]
        + jnp.dot(h0.astype(compute_dtype), w1h_ref[...],
                  preferred_element_type=jnp.float32),
        0.0)

    # Output: h1 @ W2_h + x @ W2_x + b2 (computed lane-padded, stored narrow)
    out = (xz[:, h0p + h1p:]
           + jnp.dot(h1.astype(compute_dtype), w2h_ref[...],
                     preferred_element_type=jnp.float32))
    out_ref[...] = out[:, :out_dim].astype(out_ref.dtype)


def pack_params(params, compute_dtype=jnp.bfloat16):
    """One-time weight packing: pad feature dims to 128-lane multiples, fuse the
    x-side projections / biases, and cast to the MXU compute dtype.

    Zero-padded hidden/output columns and the matching zero weight rows are
    exact no-ops through ReLU + matmul, so any hidden_units work, and every
    fused-xz slice boundary stays lane aligned.
    """
    w0, b0, w1h, w1x, b1, w2h, w2x, b2 = params
    in_dim, h0 = w0.shape
    h1 = w1h.shape[1]
    out_dim = w2h.shape[1]
    h0p = _round_up(h0, LANE)
    h1p = _round_up(h1, LANE)
    out_pad = _round_up(out_dim, LANE)

    w0p = jnp.pad(w0, ((0, 0), (0, h0p - h0)))
    b0p = jnp.pad(b0, ((0, 0), (0, h0p - h0)))
    w1xp = jnp.pad(w1x, ((0, 0), (0, h1p - h1)))
    b1p = jnp.pad(b1, ((0, 0), (0, h1p - h1)))
    w1hp = jnp.pad(w1h, ((0, h0p - h0), (0, h1p - h1)))
    w2xp = jnp.pad(w2x, ((0, 0), (0, out_pad - out_dim)))
    b2p = jnp.pad(b2, ((0, 0), (0, out_pad - out_dim)))
    w2hp = jnp.pad(w2h, ((0, h1p - h1), (0, out_pad - out_dim)))

    wx = jnp.concatenate([w0p, w1xp, w2xp], axis=1).astype(compute_dtype)
    bx = jnp.concatenate([b0p, b1p, b2p], axis=1).astype(jnp.float32)

    return dict(
        wx=wx,                              # (in_dim, h0p + h1p + out_pad)
        bx=bx,                              # (1, h0p + h1p + out_pad), f32
        w1h=w1hp.astype(compute_dtype),     # (h0p, h1p)
        w2h=w2hp.astype(compute_dtype),     # (h1p, out_pad)
        in_dim=in_dim, h0p=h0p, h1p=h1p, out_dim=out_dim, out_pad=out_pad,
        compute_dtype=compute_dtype)


def mlp_forward(x, packed, *, batch_tile=512):
    """Dense-MLP forward (ReLU, use_dense=True, no BN/dropout) in one Pallas kernel.

    `packed` comes from pack_params() (call once at parameter-build time).
    batch_tile: rows per grid step (sweep 512-1024 for large batches); it is
    capped so the grid has >= ~4 steps, which keeps both v7x TensorCores busy
    (grid is sharded via "parallel" semantics) and lets the x/out DMAs
    pipeline behind compute.
    """
    B, in_dim = x.shape
    assert in_dim == packed["in_dim"], "x feature dim does not match params"
    h0p, h1p = packed["h0p"], packed["h1p"]
    out_dim, out_pad = packed["out_dim"], packed["out_pad"]
    cdt = packed["compute_dtype"]
    xn = h0p + h1p + out_pad            # fused x-projection width (lane aligned)

    # ---- batch tiling: multiple-of-8 tiles, grid = cdiv (no batch padding) ----
    tile = _round_up(max(int(batch_tile), SUBLANE), SUBLANE)
    tile = min(tile, _round_up(pl.cdiv(B, 4), SUBLANE))   # >= ~4 grid steps
    tile = max(tile, SUBLANE)
    grid = (pl.cdiv(B, tile),)   # partial last block: OOB rows masked on store

    kernel = functools.partial(_mlp_kernel, h0p=h0p, h1p=h1p,
                               out_dim=out_dim, compute_dtype=cdt)

    # ---- scheduler hint + explicit VMEM budget ----
    cdt_size = jnp.dtype(cdt).itemsize
    weight_elems = packed["wx"].size + packed["w1h"].size + packed["w2h"].size
    flops = 2 * B * (in_dim * xn + h0p * h1p + h1p * out_pad)
    bytes_accessed = (x.size * x.dtype.itemsize
                      + weight_elems * cdt_size
                      + packed["bx"].size * 4
                      + B * out_dim * x.dtype.itemsize)
    weight_vmem = 2 * (weight_elems * cdt_size + packed["bx"].size * 4)
    block_vmem = 2 * tile * (in_dim * x.dtype.itemsize + out_dim * 4)
    interm_vmem = tile * (xn * 4 + (h0p + h1p) * (4 + cdt_size)
                          + in_dim * cdt_size + out_pad * 4)
    vmem_limit = int(min(56 << 20,
                         max(32 << 20,
                             2 * (weight_vmem + block_vmem + interm_vmem))))

    return pl.pallas_call(
        kernel,
        out_shape=jax.ShapeDtypeStruct((B, out_dim), x.dtype),
        grid_spec=pltpu.PrefetchScalarGridSpec(
            num_scalar_prefetch=0,
            grid=grid,
            in_specs=[
                pl.BlockSpec((tile, in_dim), lambda i: (i, 0)),   # x (streamed, f32)
                pl.BlockSpec((in_dim, xn), lambda i: (0, 0)),     # fused [W0|W1x|W2x]
                pl.BlockSpec((1, xn), lambda i: (0, 0)),          # fused [b0|b1|b2]
                pl.BlockSpec((h0p, h1p), lambda i: (0, 0)),       # W1_h
                pl.BlockSpec((h1p, out_pad), lambda i: (0, 0)),   # W2_h
            ],
            out_specs=pl.BlockSpec((tile, out_dim), lambda i: (i, 0)),
        ),
        compiler_params=pltpu.CompilerParams(
            dimension_semantics=("parallel",),
            vmem_limit_bytes=vmem_limit),
        cost_estimate=pl.CostEstimate(
            flops=flops, transcendentals=0, bytes_accessed=bytes_accessed),
    )(x, packed["wx"], packed["bx"], packed["w1h"], packed["w2h"])


def init_params(key, in_dim, out_dim, hidden_units=(256, 256)):
    """Deterministic nn.Linear-style init: U(-1/sqrt(fan_in), 1/sqrt(fan_in))."""
    keys = jax.random.split(key, 6)

    def linear(kw, kb, fan_in, fan_out):
        bound = 1.0 / jnp.sqrt(float(fan_in))
        w = jax.random.uniform(kw, (fan_in, fan_out), jnp.float32, -bound, bound)
        b = jax.random.uniform(kb, (1, fan_out), jnp.float32, -bound, bound)
        return w, b

    h0, h1 = hidden_units
    w0, b0 = linear(keys[0], keys[1], in_dim, h0)                 # fc0: in -> h0
    w1_full, b1 = linear(keys[2], keys[3], h0 + in_dim, h1)       # fc1: (h0+in) -> h1
    w1h, w1x = w1_full[:h0], w1_full[h0:]
    w2_full, b2 = linear(keys[4], keys[5], h1 + in_dim, out_dim)  # fc2: (h1+in) -> out
    w2h, w2x = w2_full[:h1], w2_full[h1:]
    return (w0, b0, w1h, w1x, b1, w2h, w2x, b2)


def mlp_reference(x, params, compute_dtype=jnp.bfloat16):
    """PyTorch-semantic reference (feature-axis concat), with matmul operands
    quantized to the kernel's compute dtype and f32 accumulation."""
    w0, b0, w1h, w1x, b1, w2h, w2x, b2 = params

    def q(a):
        return a.astype(compute_dtype).astype(jnp.float32)

    dot = functools.partial(jnp.dot, precision=jax.lax.Precision.HIGHEST)
    xq = q(x)
    h0 = jax.nn.relu(dot(xq, q(w0)) + b0)
    h1 = jax.nn.relu(
        dot(jnp.concatenate([q(h0), xq], axis=1),
            jnp.concatenate([q(w1h), q(w1x)], axis=0)) + b1)
    return (dot(jnp.concatenate([q(h1), xq], axis=1),
                jnp.concatenate([q(w2h), q(w2x)], axis=0)) + b2)


if __name__ == "__main__":
    key = jax.random.PRNGKey(0)
    k_x1, k_x2, k_p = jax.random.split(key, 3)

    in_dim, out_dim = 32, 8
    hidden_units = (256, 256)
    params = init_params(k_p, in_dim, out_dim, hidden_units)
    packed = pack_params(params)            # one-time weight packing / casting

    # Case 1: tiny batch -> single grid step, narrow (8-lane) output store.
    x1 = jax.random.normal(k_x1, (8, in_dim), jnp.float32)
    out1 = jax.block_until_ready(mlp_forward(x1, packed))
    ref1 = mlp_reference(x1, params)
    assert out1.shape == (8, out_dim)
    assert jnp.allclose(out1, ref1, atol=2e-3, rtol=2e-3), "mismatch (case 1)"

    # Case 2: ragged batch -> multi-step grid (tile 16, grid 3); the last block
    # is partial (rows 40..47 are OOB-masked on store, no batch padding pass).
    x2 = jax.random.normal(k_x2, (40, in_dim), jnp.float32)
    out2 = jax.block_until_ready(mlp_forward(x2, packed))
    ref2 = mlp_reference(x2, params)
    assert out2.shape == (40, out_dim)
    assert jnp.allclose(out2, ref2, atol=2e-3, rtol=2e-3), "mismatch (case 2)"

    print("KERNEL_OK")
</pallas_src>

<mosaic_0001>
module attributes {stable_mosaic.version = 11 : i64} {
  func.func @_mlp_kernel(%arg0: i32, %arg1: memref<8x32xf32, #tpu.memory_space<vmem>>, %arg2: memref<32x640xbf16, #tpu.memory_space<vmem>>, %arg3: memref<1x640xf32, #tpu.memory_space<vmem>>, %arg4: memref<256x256xbf16, #tpu.memory_space<vmem>>, %arg5: memref<256x128xbf16, #tpu.memory_space<vmem>>, %arg6: memref<8x8xf32, #tpu.memory_space<vmem>>) attributes {dimension_semantics = [#tpu.dimension_semantics<parallel>], iteration_bounds = array<i64: 1>, scalar_prefetch = 0 : i64, scratch_operands = 0 : i64, tpu.core_type = #tpu.core_type<tc>, window_params = [{transform_indices = @transform_0, window_bounds = array<i64: 8, 32>}, {pipeline_mode = #tpu.pipeline_mode<synchronous>, transform_indices = @transform_1, window_bounds = array<i64: 32, 640>}, {pipeline_mode = #tpu.pipeline_mode<synchronous>, transform_indices = @transform_2, window_bounds = array<i64: 1, 640>}, {pipeline_mode = #tpu.pipeline_mode<synchronous>, transform_indices = @transform_3, window_bounds = array<i64: 256, 256>}, {pipeline_mode = #tpu.pipeline_mode<synchronous>, transform_indices = @transform_4, window_bounds = array<i64: 256, 128>}, {transform_indices = @transform_5, window_bounds = array<i64: 8, 8>}]} {
    %c0 = arith.constant 0 : index
    %c0_0 = arith.constant 0 : index
    %0 = vector.load %arg1[%c0, %c0_0] : memref<8x32xf32, #tpu.memory_space<vmem>>, vector<8x32xf32>
    %1 = arith.truncf %0 : vector<8x32xf32> to vector<8x32xbf16>
    %c0_1 = arith.constant 0 : index
    %c0_2 = arith.constant 0 : index
    %2 = vector.load %arg2[%c0_1, %c0_2] : memref<32x640xbf16, #tpu.memory_space<vmem>>, vector<32x640xbf16>
    %cst = arith.constant dense<0.000000e+00> : vector<8x640xf32>
    %3 = tpu.matmul %1, %2, %cst {dimension_numbers = #tpu.dot_dimension_numbers<[1], [0], [0], [1], [0, 0, 1, 1], [], []>} : vector<8x32xbf16>, vector<32x640xbf16>, vector<8x640xf32> -> vector<8x640xf32>
    %c0_3 = arith.constant 0 : index
    %c0_4 = arith.constant 0 : index
    %4 = vector.load %arg3[%c0_3, %c0_4] : memref<1x640xf32, #tpu.memory_space<vmem>>, vector<1x640xf32>
    %5 = vector.broadcast %4 : vector<1x640xf32> to vector<8x640xf32>
    %6 = arith.addf %3, %5 : vector<8x640xf32>
    %7 = vector.extract_strided_slice %6 {offsets = [0, 0], sizes = [8, 256], strides = [1, 1]} : vector<8x640xf32> to vector<8x256xf32>
    %cst_5 = arith.constant 0.000000e+00 : f32
    %8 = vector.broadcast %cst_5 : f32 to vector<8x256xf32>
    %9 = arith.maximumf %7, %8 : vector<8x256xf32>
    %10 = vector.extract_strided_slice %6 {offsets = [0, 256], sizes = [8, 256], strides = [1, 1]} : vector<8x640xf32> to vector<8x256xf32>
    %11 = arith.truncf %9 : vector<8x256xf32> to vector<8x256xbf16>
    %c0_6 = arith.constant 0 : index
    %c0_7 = arith.constant 0 : index
    %12 = vector.load %arg4[%c0_6, %c0_7] : memref<256x256xbf16, #tpu.memory_space<vmem>>, vector<256x256xbf16>
    %cst_8 = arith.constant dense<0.000000e+00> : vector<8x256xf32>
    %13 = tpu.matmul %11, %12, %cst_8 {dimension_numbers = #tpu.dot_dimension_numbers<[1], [0], [0], [1], [0, 0, 1, 1], [], []>} : vector<8x256xbf16>, vector<256x256xbf16>, vector<8x256xf32> -> vector<8x256xf32>
    %14 = arith.addf %10, %13 : vector<8x256xf32>
    %cst_9 = arith.constant 0.000000e+00 : f32
    %15 = vector.broadcast %cst_9 : f32 to vector<8x256xf32>
    %16 = arith.maximumf %14, %15 : vector<8x256xf32>
    %17 = vector.extract_strided_slice %6 {offsets = [0, 512], sizes = [8, 128], strides = [1, 1]} : vector<8x640xf32> to vector<8x128xf32>
    %18 = arith.truncf %16 : vector<8x256xf32> to vector<8x256xbf16>
    %c0_10 = arith.constant 0 : index
    %c0_11 = arith.constant 0 : index
    %19 = vector.load %arg5[%c0_10, %c0_11] : memref<256x128xbf16, #tpu.memory_space<vmem>>, vector<256x128xbf16>
    %cst_12 = arith.constant dense<0.000000e+00> : vector<8x128xf32>
    %20 = tpu.matmul %18, %19, %cst_12 {dimension_numbers = #tpu.dot_dimension_numbers<[1], [0], [0], [1], [0, 0, 1, 1], [], []>} : vector<8x256xbf16>, vector<256x128xbf16>, vector<8x128xf32> -> vector<8x128xf32>
    %21 = arith.addf %17, %20 : vector<8x128xf32>
    %22 = vector.extract_strided_slice %21 {offsets = [0, 0], sizes = [8, 8], strides = [1, 1]} : vector<8x128xf32> to vector<8x8xf32>
    %c0_13 = arith.constant 0 : index
    %c0_14 = arith.constant 0 : index
    %23 = vector.load %arg6[%c0_13, %c0_14] : memref<8x8xf32, #tpu.memory_space<vmem>>, vector<8x8xf32>
    tpu.vector_store %arg6[%c0_13, %c0_14], %22 {strides = array<i32>} : memref<8x8xf32, #tpu.memory_space<vmem>>, vector<8x8xf32>,
    return
  }
  func.func @transform_0(%arg0: i32) -> (i32, i32) {
    %c0_i32 = arith.constant 0 : i32
    %c0_i32_0 = arith.constant 0 : i32
    return %arg0, %c0_i32 : i32, i32
  }
  func.func @transform_1(%arg0: i32) -> (i32, i32) {
    %c0_i32 = arith.constant 0 : i32
    %c0_i32_0 = arith.constant 0 : i32
    %c0_i32_1 = arith.constant 0 : i32
    return %c0_i32, %c0_i32_0 : i32, i32
  }
  func.func @transform_2(%arg0: i32) -> (i32, i32) {
    %c0_i32 = arith.constant 0 : i32
    %c0_i32_0 = arith.constant 0 : i32
    %c0_i32_1 = arith.constant 0 : i32
    return %c0_i32, %c0_i32_0 : i32, i32
  }
  func.func @transform_3(%arg0: i32) -> (i32, i32) {
    %c0_i32 = arith.constant 0 : i32
    %c0_i32_0 = arith.constant 0 : i32
    %c0_i32_1 = arith.constant 0 : i32
    return %c0_i32, %c0_i32_0 : i32, i32
  }
  func.func @transform_4(%arg0: i32) -> (i32, i32) {
    %c0_i32 = arith.constant 0 : i32
    %c0_i32_0 = arith.constant 0 : i32
    %c0_i32_1 = arith.constant 0 : i32
    return %c0_i32, %c0_i32_0 : i32, i32
  }
  func.func @transform_5(%arg0: i32) -> (i32, i32) {
    %c0_i32 = arith.constant 0 : i32
    %c0_i32_0 = arith.constant 0 : i32
    return %arg0, %c0_i32 : i32, i32
  }
}

</mosaic_0001>

<bundles_post_ra>
// kernel: tpu_custom_call.1
= control target key start
LH: loop header
LB: loop body
LE: loop exit
PB: predicated region body
PF: predicated region fallthrough
CT: control target
= control target key end

     0   :  { %10 = vsyncpa [#allocation3], 0  ;;  %s1148_s0 = inlined_call_operand.hbm [shape: f32[8,32], index: 0, kind: input, shape index: {}]   ;;  %s1149_s1 = inlined_call_operand.hbm [shape: bf16[32,640], index: 1, kind: input, shape index: {}]   ;;  %s1150_s2 = inlined_call_operand.vmem [shape: f32[1,640], index: 2, kind: input, shape index: {}]   ;;  %s1151_s3 = inlined_call_operand.hbm [shape: bf16[256,256], index: 3, kind: input, shape index: {}]   ;;  %s1152_s4 = inlined_call_operand.hbm [shape: bf16[256,128], index: 4, kind: input, shape index: {}]   ;;  %s1153_s5 = inlined_call_operand.hbm [shape: f32[8,8], index: 5, kind: output, shape index: {}]  }
   0x1   :  { %11 = vsyncpa [#allocation6], 0 }
   0x2   :  { %12 = vsyncpa [#allocation9], 0 }
   0x3   :  { %13 = vsyncpa [#allocation4], 0  ;;  %s1033_s18 = smov [#allocation5]   ;;  %s915_s22 = scalar_lea.hbm %s1149_s1, 1280 }
   0x4   :  { %s29_s19 = sshll.u32 %s1033_s18, 4  ;;  %p916_p0 = scmp.ne.s32.totalorder %s1149_s1, %s915_s22  ;;  %s30_s19 = int_to_ptr.vmem [resolvable:$true] %s29_s19 }
   0x5   :  { %p919_p1 = scmp.lt.u32.totalorder %s915_s22, %s1149_s1 }
   0x7   :  { %p921_p2 = pnand %p919_p1, %p916_p0 }
   0x9   :  { %924 = shalt.err (!%p921_p2)
}
   0xa   :  { %s925_s27 = scalar_lea.vmem %s30_s19, 1280  ;;  %p930_p4 = scmp.lt.s32.totalorder %s30_s19, %s30_s19 }
   0xb   :  { %p926_p3 = scmp.ne.s32.totalorder %s30_s19, %s925_s27  ;;  %p931_p5 = scmp.lt.s32.totalorder %s925_s27, %s925_s27 }
   0xd   :  { %p932_p6 = por %p931_p5, %p930_p4 }
   0xf   :  { %p933_p7 = pnand %p932_p6, %p926_p3 }
  0x11   :  { %936 = shalt.err (!%p933_p7)
}
  0x12   :  { %s1034_s28 = smov 320   ;;  %s1035_s29 = smov 20  }
  0x13   :  { %35 = dma.hbm_to_vmem [thread:$0]  %s1149_s1, 1280, %s30_s19, [#allocation6], %s1034_s28, %s1034_s28, %s1035_s29  }
  0x14   :  { %s1036_s7 = smov [#allocation2]   ;;  %s1037_s9 = smov [#allocation7]  }
  0x15   :  { %s20_s8 = sshll.u32 %s1036_s7, 4  ;;  %s43_s10 = sshll.u32 %s1037_s9, 4  ;;  %s21_s8 = int_to_ptr.vmem [resolvable:$true] %s20_s8  ;;  %s44_s10 = int_to_ptr.vmem [resolvable:$true] %s43_s10 }
  0x16   :  { %s937_s13 = scalar_lea.hbm %s1148_s0, 128 }
  0x17   :  { %p938_p8 = scmp.ne.s32.totalorder %s1148_s0, %s937_s13  ;;  %p941_p9 = scmp.lt.u32.totalorder %s937_s13, %s1148_s0 }
  0x19   :  { %p943_p10 = pnand %p941_p9, %p938_p8 }
  0x1b   :  { %946 = shalt.err (!%p943_p10)
}
  0x1c   :  { %s947_s1 = scalar_lea.vmem %s21_s8, 128  ;;  %p952_p12 = scmp.lt.s32.totalorder %s21_s8, %s21_s8 }
  0x1d   :  { %p948_p11 = scmp.ne.s32.totalorder %s21_s8, %s947_s1  ;;  %p953_p13 = scmp.lt.s32.totalorder %s947_s1, %s947_s1 }
  0x1f   :  { %p954_p0 = por %p953_p13, %p952_p12 }
  0x21   :  { %p955_p1 = pnand %p954_p0, %p948_p11 }
  0x23   :  { %958 = shalt.err (!%p955_p1)
}
  0x24   :  { %23 = dma.hbm_to_vmem [thread:$0]  %s1148_s0, 128, %s21_s8, [#allocation3]  }
  0x25   :  { %s959_s22 = scalar_lea.hbm %s1151_s3, 4096 }
  0x26   :  { %p960_p2 = scmp.ne.s32.totalorder %s1151_s3, %s959_s22  ;;  %p963_p3 = scmp.lt.u32.totalorder %s959_s22, %s1151_s3 }
  0x28   :  { %p965_p4 = pnand %p963_p3, %p960_p2 }
  0x2a   :  { %968 = shalt.err (!%p965_p4)
}
  0x2b   :  { %s969_s27 = scalar_lea.vmem %s44_s10, 4096  ;;  %p974_p6 = scmp.lt.s32.totalorder %s44_s10, %s44_s10 }
  0x2c   :  { %p970_p5 = scmp.ne.s32.totalorder %s44_s10, %s969_s27  ;;  %p975_p7 = scmp.lt.s32.totalorder %s969_s27, %s969_s27 }
  0x2e   :  { %p976_p8 = por %p975_p7, %p974_p6 }
  0x30   :  { %p977_p9 = pnand %p976_p8, %p970_p5 }
  0x32   :  { %980 = shalt.err (!%p977_p9)
}
  0x33   :  { %s1038_s0 = smov 128   ;;  %s1039_s28 = smov 8  }
  0x34   :  { %49 = dma.hbm_to_vmem [thread:$0]  %s1151_s3, 4096, %s44_s10, [#allocation6], %s1038_s0, %s1038_s0, %s1039_s28  }
  0x35   :  { %s1040_s6 = smov [#allocation8]   ;;  %s981_s11 = scalar_lea.hbm %s1152_s4, 2048 }
  0x36   :  { %s55_s7 = sshll.u32 %s1040_s6, 4  ;;  %p982_p10 = scmp.ne.s32.totalorder %s1152_s4, %s981_s11  ;;  %s56_s7 = int_to_ptr.vmem [resolvable:$true] %s55_s7 }
  0x37   :  { %p985_p11 = scmp.lt.u32.totalorder %s981_s11, %s1152_s4 }
  0x39   :  { %p987_p12 = pnand %p985_p11, %p982_p10 }
  0x3b   :  { %990 = shalt.err (!%p987_p12)
}
  0x3c   :  { %s991_s16 = scalar_lea.vmem %s56_s7, 2048  ;;  %p996_p0 = scmp.lt.s32.totalorder %s56_s7, %s56_s7 }
  0x3d   :  { %p992_p13 = scmp.ne.s32.totalorder %s56_s7, %s991_s16  ;;  %p997_p1 = scmp.lt.s32.totalorder %s991_s16, %s991_s16 }
  0x3f   :  { %p998_p2 = por %p997_p1, %p996_p0 }
  0x41   :  { %p999_p3 = pnand %p998_p2, %p992_p13 }
  0x43   :  { %1002 = shalt.err (!%p999_p3)
}
  0x44   :  { %s1041_s3 = smov 64   ;;  %s1042_s10 = smov 4  }
  0x45   :  { %61 = dma.hbm_to_vmem [thread:$0]  %s1152_s4, 2048, %s56_s7, [#allocation9], %s1041_s3, %s1041_s3, %s1042_s10  }
  0x46   :  { %1025 = dma.done.wait [#allocation3], 128  }
  0x47   :  { %1026 = vsyncadd [#allocation3], 4294967168 }
  0x48   :  { %1027 = dma.done.wait [#allocation6], 5376  }
  0x49   :  { %1028 = vsyncadd [#allocation6], 4294961920 }
  0x4a   :  { %1029 = dma.done.wait [#allocation9], 2048  }
  0x4b   :  { %1030 = vsyncadd [#allocation9], 4294965248  ;;  %v1043_v0 = vmov 0   ;;  %v837_v1 = vld [vmem:[#allocation5 + $0x4] ss:$20 sps:$4 sm:$0xff]   ;;  %vm168_vm0 = vcmask 261120   ;;  %v91_v58 = vlaneseq }
  0x4c   :  { %204 = vmatprep.mubr.bf16.mxu0 %v1043_v0  ;;  %v839_v2 = vld [vmem:[#allocation5] ss:$20 sps:$4 sm:$0xff]   ;;  %172 = vmatprep.subr.bf16.mxu0 %v837_v1  ;;  %v842_v4 = vld [vmem:[#allocation5 + $0x28] ss:$20 sps:$4 sm:$0xff]   ;;  %v845_v7 = vld [vmem:[#allocation7] ss:$8 sps:$4 sm:$0xff]  }
  0x4d   :  { %v840_v3 = vld [vmem:[#allocation5 + $0x2c] ss:$20 sps:$4 sm:$0xff]   ;;  %v75_v5 = vld [vmem:[#allocation2] sm:$0xff]  ;;  %173 = vmatpush1.bf16.msra.mxu0 %v839_v2  ;;  %v890_v37 = vld [vmem:[#allocation5 + $0x34] ss:$20 sps:$4 sm:$0xff]   ;;  %v1044_v44 = vmov 0.0  }
  0x4e   :  { %v843_v6 = vld [vmem:[#allocation7 + $0x4] ss:$8 sps:$4 sm:$0xff]   ;;  %174 = vmatprep.subr.bf16.mxu0 %v840_v3  ;;  %v846_v8 = vld [vmem:[#allocation7 + $0x14] ss:$8 sps:$4 sm:$0xff]   ;;  %v1125_v9 = vpack.c.bf16 %v75_v5, %v75_v5  ;;  %v848_v10 = vld [vmem:[#allocation7 + $0x10] ss:$8 sps:$4 sm:$0xff]  }
  0x4f   :  { %490 = vmatprep.subr.bf16.mxu1 %v843_v6  ;;  %v849_v11 = vld [vmem:[#allocation7 + $0x24] ss:$8 sps:$4 sm:$0xff]   ;;  %v851_v12 = vld [vmem:[#allocation7 + $0x20] ss:$8 sps:$4 sm:$0xff]   ;;  %v852_v13 = vld [vmem:[#allocation7 + $0x34] ss:$8 sps:$4 sm:$0xff]  }
  0x50   :  { %491 = vmatpush1.bf16.msra.mxu1 %v845_v7  ;;  %v854_v14 = vld [vmem:[#allocation7 + $0x30] ss:$8 sps:$4 sm:$0xff]   ;;  %v855_v15 = vld [vmem:[#allocation7 + $0x44] ss:$8 sps:$4 sm:$0xff]   ;;  %v857_v16 = vld [vmem:[#allocation7 + $0x40] ss:$8 sps:$4 sm:$0xff]  }
  0x51   :  { %175 = vmatpush1.bf16.msra.mxu0 %v842_v4  ;;  %492 = vmatprep.subr.bf16.mxu1 %v846_v8  ;;  %v858_v17 = vld [vmem:[#allocation7 + $0x54] ss:$8 sps:$4 sm:$0xff]   ;;  %v882_v18 = vld [vmem:[#allocation5 + $0x8] ss:$20 sps:$4 sm:$0xff]   ;;  %v863_v22 = vld [vmem:[#allocation7 + $0x60] ss:$8 sps:$4 sm:$0xff]  }
  0x52   :  { %v884_v19 = vld [vmem:[#allocation5 + $0xc] ss:$20 sps:$4 sm:$0xff]   ;;  %v861_v21 = vld [vmem:[#allocation7 + $0x64] ss:$8 sps:$4 sm:$0xff]   ;;  %v869_v26 = vld [vmem:[#allocation7 + $0x80] ss:$8 sps:$4 sm:$0xff]  }
  0x53   :  { %v860_v20 = vld [vmem:[#allocation7 + $0x50] ss:$8 sps:$4 sm:$0xff]   ;;  %213 = vmatprep.subr.bf16.mxu0 %v884_v19  ;;  %v864_v23 = vld [vmem:[#allocation7 + $0x74] ss:$8 sps:$4 sm:$0xff]   ;;  %v867_v25 = vld [vmem:[#allocation7 + $0x84] ss:$8 sps:$4 sm:$0xff]  }
  0x54   :  { %735 = vmatmul.mubr.msk.bf16.vlgmr.msra.gmra.mrb[0].mxu0 %vm168_vm0, %v1125_v9  ;;  %493 = vmatpush1.bf16.msra.mxu1 %v848_v10  ;;  %v866_v24 = vld [vmem:[#allocation7 + $0x70] ss:$8 sps:$4 sm:$0xff]   ;;  %v870_v27 = vld [vmem:[#allocation7 + $0x94] ss:$8 sps:$4 sm:$0xff]   ;;  %v873_v29 = vld [vmem:[#allocation7 + $0xa4] ss:$8 sps:$4 sm:$0xff]  }
  0x55   :  { %494 = vmatprep.subr.bf16.mxu1 %v849_v11  ;;  %245 = vmatprep.mubr.bf16.mxu0 %v1043_v0  ;;  %v872_v28 = vld [vmem:[#allocation7 + $0x90] ss:$8 sps:$4 sm:$0xff]   ;;  %v875_v30 = vld [vmem:[#allocation7 + $0xa0] ss:$8 sps:$4 sm:$0xff]   ;;  %v876_v31 = vld [vmem:[#allocation7 + $0xb4] ss:$8 sps:$4 sm:$0xff]  }
  0x56   :  { %214 = vmatpush1.bf16.msra.mxu0 %v882_v18  ;;  %v878_v32 = vld [vmem:[#allocation7 + $0xb0] ss:$8 sps:$4 sm:$0xff]   ;;  %v879_v33 = vld [vmem:[#allocation7 + $0xc4] ss:$8 sps:$4 sm:$0xff]   ;;  %v881_v34 = vld [vmem:[#allocation7 + $0xc0] ss:$8 sps:$4 sm:$0xff]  }
  0x57   :  { %v885_v35 = vld [vmem:[#allocation7 + $0xd4] ss:$8 sps:$4 sm:$0xff]   ;;  %v887_v36 = vld [vmem:[#allocation7 + $0xd0] ss:$8 sps:$4 sm:$0xff]   ;;  %v891_v39 = vld [vmem:[#allocation7 + $0xe4] ss:$8 sps:$4 sm:$0xff]   ;;  %215 = vmatprep.subr.bf16.mxu0 %v890_v37 }
  0x58   :  { %495 = vmatpush1.bf16.msra.mxu1 %v851_v12  ;;  %v888_v38 = vld [vmem:[#allocation5 + $0x30] ss:$20 sps:$4 sm:$0xff]   ;;  %v896_v42 = vld [vmem:[#allocation7 + $0xf0] ss:$8 sps:$4 sm:$0xff]   ;;  %vm1045_vm1 = vmmov 0   ;;  %v901_v48 = vld [vmem:[#allocation8 + $0x48] sm:$0xff]  }
  0x59   :  { %496 = vmatprep.subr.bf16.mxu1 %v852_v13  ;;  %v893_v40 = vld [vmem:[#allocation7 + $0xe0] ss:$8 sps:$4 sm:$0xff]   ;;  %v894_v41 = vld [vmem:[#allocation7 + $0xf4] ss:$8 sps:$4 sm:$0xff]   ;;  %v92_v59 = vshrl.u32 %v91_v58, 7  ;;  %vm706_vm2 = vcmask 64512  }
  0x5a   :  { %216 = vmatpush1.bf16.msra.mxu0 %v888_v38  ;;  %v897_v43 = vld [vmem:[#allocation5 + $0x10] ss:$20 sps:$4 sm:$0xff]   ;;  %v898_v45 = vld [vmem:[#allocation5 + $0x38] ss:$20 sps:$4 sm:$0xff]  }
  0x5b   :  { %811 = vmatprep.subr.bf16.mxu0 %v1044_v44  ;;  %v899_v46 = vld [vmem:[#allocation8 + $0x40] sm:$0xff]   ;;  %v902_v49 = vld [vmem:[#allocation8 + $0x8] sm:$0xff]   ;;  %v903_v50 = vld [vmem:[#allocation8 + $0x50] sm:$0xff]   ;;  %v93_v60 = vsub.s32 0, %v92_v59  ;;  %v97_v62 = vsub.s32 1, %v92_v59 }
  0x5c   :  { %497 = vmatpush1.bf16.msra.mxu1 %v854_v14  ;;  %v900_v47 = vld [vmem:[#allocation8] sm:$0xff]   ;;  %v904_v51 = vld [vmem:[#allocation8 + $0x10] sm:$0xff]   ;;  %v905_v52 = vld [vmem:[#allocation8 + $0x58] sm:$0xff]  }
  0x5d   :  { %498 = vmatprep.subr.bf16.mxu1 %v855_v15  ;;  %736 = vmatmul.mubr.msk.bf16.vlgmr.msra.gmra.mrb[4].mxu0 %vm168_vm0, %v1125_v9  ;;  %v906_v53 = vld [vmem:[#allocation8 + $0x18] sm:$0xff]   ;;  %v907_v54 = vld [vmem:[#allocation8 + $0x60] sm:$0xff]   ;;  %v909_v56 = vld [vmem:[#allocation8 + $0x68] sm:$0xff]  }
  0x5e   :  { %815 = vmatprep.mubr.msk.bf16.mxu0 %vm1045_vm1, %v1044_v44  ;;  %812 = vmatpush3.bf16.msra.mxu0 %v897_v43  ;;  %v908_v55 = vld [vmem:[#allocation8 + $0x20] sm:$0xff]   ;;  %v910_v57 = vld [vmem:[#allocation8 + $0x28] sm:$0xff]   ;;  %v911_v15 = vld [vmem:[#allocation8 + $0x70] sm:$0xff]  }
  0x5f   :  { %813 = vmatprep.subr.bf16.mxu0 %v1044_v44  ;;  %v89_v61 = vld [vmem:[%s1150_s2] sm:$0x1f]  ;;  %v914_v18 = vld [vmem:[#allocation8 + $0x38] sm:$0xff]   ;;  %s1046_s2 = smov [#allocation10]  }
  0x60   :  { %499 = vmatpush1.bf16.msra.mxu1 %v857_v16  ;;  %v94_v63 = vrot.slane %v89_v61, %v93_v60  ;;  %v98_v0 = vrot.slane %v89_v61, %v97_v62  ;;  %v912_v16 = vld [vmem:[#allocation8 + $0x30] sm:$0xff]   ;;  %s714_s19 = sshll.u32 %s1046_s2, 4  ;;  %s715_s19 = int_to_ptr.vmem [resolvable:$true] %s714_s19 }
  0x61   :  { %500 = vmatprep.subr.bf16.mxu1 %v858_v17  ;;  %v913_v17 = vld [vmem:[#allocation8 + $0x78] sm:$0xff]   ;;  %s1003_s20 = scalar_lea.vmem %s715_s19, 128  ;;  %p1008_p5 = scmp.lt.s32.totalorder %s715_s19, %s715_s19 }
  0x62   :  { %814 = vmatpush3.bf16.msra.mxu0 %v898_v45  ;;  %p1004_p4 = scmp.ne.s32.totalorder %s715_s19, %s1003_s20  ;;  %p1009_p6 = scmp.lt.s32.totalorder %s1003_s20, %s1003_s20 }
  0x63   :  { %789 = vmatprep.subr.bf16.mxu0 %v899_v46 }
  0x64   :  { %501 = vmatpush1.bf16.msra.mxu1 %v860_v20  ;;  %p1010_p7 = por %p1009_p6, %p1008_p5 }
  0x65   :  { %502 = vmatprep.subr.bf16.mxu1 %v861_v21  ;;  %816 = vmatmul.mubr.msk.bf16.vlgmr.msra.gmra.mrb[8].mxu0 %vm168_vm0, %v1125_v9 }
  0x66   :  { %790 = vmatpush3.bf16.msra.mxu0 %v900_v47  ;;  %p1011_p8 = pnand %p1010_p7, %p1004_p4 }
  0x67   :  { %791 = vmatprep.subr.bf16.mxu0 %v901_v48 }
  0x68   :  { %503 = vmatpush1.bf16.msra.mxu1 %v863_v22 }
  0x69   :  { %504 = vmatprep.subr.bf16.mxu1 %v864_v23  ;;  %v101_v23 = vsub.s32 2, %v92_v59 }
  0x6a   :  { %792 = vmatpush3.bf16.msra.mxu0 %v902_v49 }
  0x6b   :  { %793 = vmatprep.subr.bf16.mxu0 %v903_v50 }
  0x6c   :  { %505 = vmatpush1.bf16.msra.mxu1 %v866_v24  ;;  %v105_v24 = vsub.s32 3, %v92_v59 }
  0x6d   :  { %506 = vmatprep.subr.bf16.mxu1 %v867_v25  ;;  %v102_v25 = vrot.slane %v89_v61, %v101_v23 }
  0x6e   :  { %794 = vmatpush3.bf16.msra.mxu0 %v904_v51 }
  0x6f   :  { %795 = vmatprep.subr.bf16.mxu0 %v905_v52 }
  0x70   :  { %507 = vmatpush1.bf16.msra.mxu1 %v869_v26  ;;  %v106_v26 = vrot.slane %v89_v61, %v105_v24 }
  0x71   :  { %508 = vmatprep.subr.bf16.mxu1 %v870_v27 }
  0x72   :  { %796 = vmatpush3.bf16.msra.mxu0 %v906_v53 }
  0x73   :  { %797 = vmatprep.subr.bf16.mxu0 %v907_v54 }
  0x74   :  { %509 = vmatpush1.bf16.msra.mxu1 %v872_v28 }
  0x75   :  { %510 = vmatprep.subr.bf16.mxu1 %v873_v29 }
  0x76   :  { %798 = vmatpush3.bf16.msra.mxu0 %v908_v55 }
  0x77   :  { %799 = vmatprep.subr.bf16.mxu0 %v909_v56 }
  0x78   :  { %511 = vmatpush1.bf16.msra.mxu1 %v875_v30 }
  0x79   :  { %512 = vmatprep.subr.bf16.mxu1 %v876_v31 }
  0x7a   :  { %800 = vmatpush3.bf16.msra.mxu0 %v910_v57 }
  0x7b   :  { %801 = vmatprep.subr.bf16.mxu0 %v911_v15 }
  0x7c   :  { %513 = vmatpush1.bf16.msra.mxu1 %v878_v32 }
  0x7d   :  { %514 = vmatprep.subr.bf16.mxu1 %v879_v33 }
  0x7e   :  { %802 = vmatpush3.bf16.msra.mxu0 %v912_v16 }
  0x7f   :  { %803 = vmatprep.subr.bf16.mxu0 %v913_v17 }
  0x80   :  { %515 = vmatpush1.bf16.msra.mxu1 %v881_v34 }
  0x81   :  { %516 = vmatprep.subr.bf16.mxu1 %v885_v35 }
  0x82   :  { %804 = vmatpush3.bf16.msra.mxu0 %v914_v18 }
  0x84   :  { %517 = vmatpush1.bf16.msra.mxu1 %v887_v36 }
  0x85   :  { %518 = vmatprep.subr.bf16.mxu1 %v891_v39  ;;  %v109_v39 = vsub.s32 4, %v92_v59 }
  0x88   :  { %519 = vmatpush1.bf16.msra.mxu1 %v893_v40  ;;  %v110_v40 = vrot.slane %v89_v61, %v109_v39 }
  0x89   :  { %520 = vmatprep.subr.bf16.mxu1 %v894_v41 }
  0x8c   :  { %521 = vmatpush1.bf16.msra.mxu1 %v896_v42 }
 0x127   :  { %v206_v1 = vpop.f32.mrb[0].mxu0 }
 0x128   :  { %v207_v2 = vadd.f32 %v206_v1, %v94_v63  ;;  %v208_v3 = vpop.f32.mrb[1].mxu0 }
 0x129   :  { %v209_v4 = vadd.f32 %v208_v3, %v98_v0  ;;  %v210_v5 = vpop.f32.mrb[2].mxu0 }
 0x12a   :  { %v294_v6 = vmax.f32 %v207_v2, 0.0  ;;  %v211_v7 = vpop.f32.mrb[3].mxu0 }
 0x12b   :  { %v295_v8 = vmax.f32 %v209_v4, 0.0 }
 0x12c   :  { %v296_v10 = vpack.c.bf16 %v294_v6, %v294_v6 }
 0x12d   :  { %v297_v9 = vpack.c.bf16 %v295_v8, %v295_v8 }
 0x12f   :  { %522 = vmatprep.mubr.bf16.mxu1 %v297_v9 }
 0x130   :  { %523 = vmatmul.mubr.bf16.vlgmr.msra.gmra.mrb[0].mxu1 %v296_v10  ;;  %v247_v11 = vpop.f32.mrb[4].mxu0 }
 0x131   :  { %v249_v12 = vpop.f32.mrb[5].mxu0  ;;  %v248_v27 = vadd.f32 %v247_v11, %v102_v25 }
 0x132   :  { %v251_v13 = vpop.f32.mrb[6].mxu0  ;;  %v250_v28 = vadd.f32 %v249_v12, %v106_v26 }
 0x133   :  { %v252_v14 = vpop.f32.mrb[7].mxu0 }
 0x138   :  { %v288_v19 = vpop.f32.mrb[8].mxu0 }
 0x139   :  { %v817_v20 = vpop.f32.mrb[9].mxu0  ;;  %v289_v43 = vadd.f32 %v288_v19, %v110_v40 }
 0x13a   :  { %v291_v21 = vpop.f32.mrb[10].mxu0 }
 0x13b   :  { %v818_v22 = vpop.f32.mrb[11].mxu0 }
 0x203   :  { %v524_v29 = vpop.f32.mrb[0].mxu1 }
 0x204   :  { %v531_v30 = vadd.f32 %v524_v29, %v248_v27  ;;  %v526_v31 = vpop.f32.mrb[1].mxu1 }
 0x205   :  { %v532_v32 = vadd.f32 %v526_v31, %v250_v28  ;;  %v528_v33 = vpop.f32.mrb[2].mxu1 }
 0x206   :  { %v533_v34 = vmax.f32 %v531_v30, 0.0  ;;  %v529_v35 = vpop.f32.mrb[3].mxu1 }
 0x207   :  { %v534_v36 = vmax.f32 %v532_v32, 0.0 }
 0x208   :  { %v535_v38 = vpack.c.bf16 %v533_v34, %v533_v34 }
 0x209   :  { %v536_v37 = vpack.c.bf16 %v534_v36, %v534_v36 }
 0x20b   :  { %697 = vmatprep.mubr.bf16.mxu0 %v536_v37 }
 0x20c   :  { %698 = vmatmul.mubr.bf16.vlgmr.msra.gmra.mrb[12].mxu0 %v535_v38 }
 0x2df   :  { %v805_v41 = vpop.f32.mrb[12].mxu0 }
 0x2e0   :  { %v806_v42 = vpop.f32.mrb[13].mxu0 }
 0x2e1   :  { %v807_v44 = vadd.f32 %v806_v42, %v805_v41  ;;  %v808_v45 = vpop.f32.mrb[14].mxu0 }
 0x2e2   :  { %v809_v46 = vpop.f32.mrb[15].mxu0 }
 0x2e3   :  { %v705_v47 = vadd.f32 %v807_v44, %v289_v43 }
 0x2e5   :  { %707 = vst.msk [vmem:[#allocation10] sm:$0xff] %vm706_vm2, %v705_v47 }
 0x2e6   :  { %1014 = shalt.err (!%p1011_p8)
}
 0x2e7   :  { %s1015_s23 = scalar_lea.hbm %s1153_s5, 128 }
 0x2e8   :  { %p1016_p9 = scmp.ne.s32.totalorder %s1153_s5, %s1015_s23  ;;  %p1019_p10 = scmp.lt.u32.totalorder %s1015_s23, %s1153_s5 }
 0x2ea   :  { %p1021_p11 = pnand %p1019_p10, %p1016_p9 }
 0x2ec   :  { %1024 = shalt.err (!%p1021_p11)
}
 0x2ed   :  { %717 = dma.vmem_to_hbm [thread:$0]  %s715_s19, 128, %s1153_s5, [#allocation4]  }
 0x2ee   :  { %1031 = dma.done.wait [#allocation4], 128  }
 0x2ef   :  { %1032 = vsyncadd [#allocation4], 4294967168 }
 0x2f0   :  { %721 = vsyncpa [#allocation3], 1 }
 0x2f1   :  { %722 = vsyncpa [#allocation6], 1 }
 0x2f2   :  { %723 = vsyncpa [#allocation9], 1 }
 0x2f3   :  { %724 = vsyncpa [#allocation4], 1 }

</bundles_post_ra>
